<compile_context>
chip_gen: v6e
topology: v6e:2x2x1
jax: 0.10.0
libtpu: 0.0.40
codegen_flags: <defaults>
</compile_context>

<pallas_src>
import functools

import jax
import jax.numpy as jnp
from jax.experimental import pallas as pl
from jax.experimental.pallas import tpu as pltpu

LEAKY_SLOPE = 0.01      # nn.LeakyReLU default negative_slope
LANE = 128


def _round_up(x, m):
    return ((x + m - 1) // m) * m


def _leaky_relu(x):
    # max(x, a*x) == LeakyReLU(x) for 0 < a < 1: one vmul + one vmax.
    return jnp.maximum(x, LEAKY_SLOPE * x)


def gating_kernel(x_ref, w1_ref, b1_ref, w2_ref, b2_ref, w3_ref, b3_ref, o_ref):
    """Feature-major gating MLP on one lane-dense batch tile.

    x_ref  : (state_dim, TB) bf16  -- batch along lanes, fully dense
    w*_ref : transposed weights (bf16); b*_ref: (dim, 1) f32
    o_ref  : (num_experts, TB) f32 -- softmax over the sublane (expert) axis
    """
    x = x_ref[...]

    h1 = jnp.dot(w1_ref[...], x, preferred_element_type=jnp.float32) + b1_ref[...]
    h1 = _leaky_relu(h1)                                        # (128, TB) f32

    h2 = jnp.dot(w2_ref[...], h1.astype(jnp.bfloat16),
                 preferred_element_type=jnp.float32) + b2_ref[...]
    h2 = _leaky_relu(h2)                                        # (64, TB) f32

    logits = jnp.dot(w3_ref[...], h2.astype(jnp.bfloat16),
                     preferred_element_type=jnp.float32) + b3_ref[...]  # (ne, TB)

    # Softmax over the expert (sublane) axis; the 8-deep cross-sublane max/sum
    # go to the XLU (separate slot), the reciprocal goes to the EUP.
    m = jnp.max(logits, axis=0, keepdims=True)
    e = jnp.exp(logits - m)
    s = jnp.sum(e, axis=0, keepdims=True)
    o_ref[...] = e * pl.reciprocal(s, approx=True)


def prepare_params(params):
    """Transpose weights to feature-major layout and cast to bf16.

    Call ONCE and reuse; keeps the transpose/cast ops (and their dispatch
    overhead) out of the latency-critical forward path.
    """
    return {
        "w1_t": jnp.asarray(params["w1"].T, jnp.bfloat16),          # (h1, S)
        "b1_t": jnp.asarray(params["b1"], jnp.float32).reshape(-1, 1),
        "w2_t": jnp.asarray(params["w2"].T, jnp.bfloat16),          # (h2, h1)
        "b2_t": jnp.asarray(params["b2"], jnp.float32).reshape(-1, 1),
        "w3_t": jnp.asarray(params["w3"].T, jnp.bfloat16),          # (ne, h2)
        "b3_t": jnp.asarray(params["b3"], jnp.float32).reshape(-1, 1),
    }


def gating_forward_packed(state, prepared, *, batch_tile=2048):
    """Gate weights in packed, lane-dense (num_experts, B_pad) layout."""
    B, state_dim = state.shape
    ne = prepared["w3_t"].shape[0]
    assert batch_tile % LANE == 0, "batch_tile must be a multiple of 128 lanes"

    # Batch lives on the lane axis, so the tile must be a multiple of 128.
    # Cap at ~ceil(B/2) so the grid has >= 2 steps whenever possible and both
    # v7x TensorCores get work (neutral on single-core v5e/v6e).
    TB = min(batch_tile, _round_up(pl.cdiv(B, 2), LANE))
    B_pad = _round_up(B, TB)

    # Feature-major, lane-dense input: (state_dim, B_pad) bf16.
    x_t = state.T.astype(jnp.bfloat16)
    if B_pad != B:
        x_t = jnp.pad(x_t, ((0, 0), (0, B_pad - B)))

    const = lambda a: pl.BlockSpec(a.shape, lambda i: (0,) * a.ndim)

    return pl.pallas_call(
        gating_kernel,
        out_shape=jax.ShapeDtypeStruct((ne, B_pad), jnp.float32),
        grid=(B_pad // TB,),
        in_specs=[
            pl.BlockSpec((state_dim, TB), lambda i: (0, i)),     # batch-tiled x
            const(prepared["w1_t"]), const(prepared["b1_t"]),    # resident
            const(prepared["w2_t"]), const(prepared["b2_t"]),    # weights /
            const(prepared["w3_t"]), const(prepared["b3_t"]),    # biases
        ],
        out_specs=pl.BlockSpec((ne, TB), lambda i: (0, i)),
        compiler_params=pltpu.CompilerParams(
            dimension_semantics=("parallel",),        # megacore split on v7x
            vmem_limit_bytes=32 * 1024 * 1024,        # fits v7x's 64 MiB VMEM
        ),
    )(x_t, prepared["w1_t"], prepared["b1_t"], prepared["w2_t"],
      prepared["b2_t"], prepared["w3_t"], prepared["b3_t"])


def gating_forward(state, prepared, *, batch_tile=2048):
    """PyTorch-parity API: (B, state_dim) -> (B, num_experts) softmax gates.

    Bandwidth-sensitive consumers should use gating_forward_packed() directly
    (the (ne, B) slab is tiny); this transpose only exists for API parity.
    """
    B = state.shape[0]
    out = gating_forward_packed(state, prepared, batch_tile=batch_tile)
    return out[:, :B].T


# ----------------------------- init / reference -----------------------------

def xavier_uniform(key, fan_in, fan_out, dtype=jnp.float32):
    """Matches torch.nn.init.xavier_uniform_ (gain=1). Returns (fan_in, fan_out)."""
    bound = (6.0 / (fan_in + fan_out)) ** 0.5
    return jax.random.uniform(key, (fan_in, fan_out), dtype, minval=-bound, maxval=bound)


def init_params(key, state_dim, num_experts, hidden_dims=(128, 64)):
    k1, k2, k3 = jax.random.split(key, 3)
    h1, h2 = hidden_dims
    return {
        "w1": xavier_uniform(k1, state_dim, h1),
        "b1": jnp.zeros((h1,), jnp.float32),
        "w2": xavier_uniform(k2, h1, h2),
        "b2": jnp.zeros((h2,), jnp.float32),
        "w3": xavier_uniform(k3, h2, num_experts),
        "b3": jnp.zeros((num_experts,), jnp.float32),
    }


def reference_forward(state, params):
    """Plain-JAX f32 reference for correctness checking."""
    h = _leaky_relu(state @ params["w1"] + params["b1"])
    h = _leaky_relu(h @ params["w2"] + params["b2"])
    logits = h @ params["w3"] + params["b3"]
    return jax.nn.softmax(logits, axis=-1)


if __name__ == "__main__":
    key = jax.random.PRNGKey(0)
    k_params, k_state = jax.random.split(key)

    batch = 8
    state_dim = 16
    num_experts = 8
    hidden_dims = (128, 64)

    params = init_params(k_params, state_dim, num_experts, hidden_dims)
    prepared = prepare_params(params)          # hoisted: pad/cast/transpose once
    state = jax.random.normal(k_state, (batch, state_dim), jnp.float32)

    # Small-batch path (single grid step), jitted end-to-end.
    gate = jax.jit(functools.partial(gating_forward, batch_tile=2048))
    out = jax.block_until_ready(gate(state, prepared))
    ref = reference_forward(state, params)
    assert out.shape == (batch, num_experts)
    assert jnp.allclose(jnp.sum(out, axis=-1), 1.0, atol=5e-3)
    assert jnp.allclose(out, ref, atol=2e-2, rtol=2e-2)

    # Multi-tile path: non-multiple batch with a small tile to exercise the
    # grid + lane-padding logic (300 rows -> 2 tiles of 256 lanes).
    state2 = jax.random.normal(jax.random.PRNGKey(1), (300, state_dim), jnp.float32)
    out2 = jax.block_until_ready(gating_forward(state2, prepared, batch_tile=256))
    ref2 = reference_forward(state2, params)
    assert out2.shape == (300, num_experts)
    assert jnp.allclose(jnp.sum(out2, axis=-1), 1.0, atol=5e-3)
    assert jnp.allclose(out2, ref2, atol=2e-2, rtol=2e-2)

    print("KERNEL_OK")
</pallas_src>

<mosaic_0001>
module attributes {stable_mosaic.version = 11 : i64} {
  func.func @gating_kernel(%arg0: i32, %arg1: memref<16x128xbf16, #tpu.memory_space<vmem>>, %arg2: memref<128x16xbf16, #tpu.memory_space<vmem>>, %arg3: memref<128x1xf32, #tpu.memory_space<vmem>>, %arg4: memref<64x128xbf16, #tpu.memory_space<vmem>>, %arg5: memref<64x1xf32, #tpu.memory_space<vmem>>, %arg6: memref<8x64xbf16, #tpu.memory_space<vmem>>, %arg7: memref<8x1xf32, #tpu.memory_space<vmem>>, %arg8: memref<8x128xf32, #tpu.memory_space<vmem>>) attributes {dimension_semantics = [#tpu.dimension_semantics<parallel>], iteration_bounds = array<i64: 1>, scalar_prefetch = 0 : i64, scratch_operands = 0 : i64, tpu.core_type = #tpu.core_type<tc>, window_params = [{transform_indices = @transform_0, window_bounds = array<i64: 16, 128>}, {pipeline_mode = #tpu.pipeline_mode<synchronous>, transform_indices = @transform_1, window_bounds = array<i64: 128, 16>}, {pipeline_mode = #tpu.pipeline_mode<synchronous>, transform_indices = @transform_2, window_bounds = array<i64: 128, 1>}, {pipeline_mode = #tpu.pipeline_mode<synchronous>, transform_indices = @transform_3, window_bounds = array<i64: 64, 128>}, {pipeline_mode = #tpu.pipeline_mode<synchronous>, transform_indices = @transform_4, window_bounds = array<i64: 64, 1>}, {pipeline_mode = #tpu.pipeline_mode<synchronous>, transform_indices = @transform_5, window_bounds = array<i64: 8, 64>}, {pipeline_mode = #tpu.pipeline_mode<synchronous>, transform_indices = @transform_6, window_bounds = array<i64: 8, 1>}, {transform_indices = @transform_7, window_bounds = array<i64: 8, 128>}]} {
    %c0 = arith.constant 0 : index
    %c0_0 = arith.constant 0 : index
    %0 = vector.load %arg1[%c0, %c0_0] : memref<16x128xbf16, #tpu.memory_space<vmem>>, vector<16x128xbf16>
    %c0_1 = arith.constant 0 : index
    %c0_2 = arith.constant 0 : index
    %1 = vector.load %arg2[%c0_1, %c0_2] : memref<128x16xbf16, #tpu.memory_space<vmem>>, vector<128x16xbf16>
    %cst = arith.constant dense<0.000000e+00> : vector<128x128xf32>
    %2 = tpu.matmul %1, %0, %cst {dimension_numbers = #tpu.dot_dimension_numbers<[1], [0], [0], [1], [0, 0, 1, 1], [], []>} : vector<128x16xbf16>, vector<16x128xbf16>, vector<128x128xf32> -> vector<128x128xf32>
    %c0_3 = arith.constant 0 : index
    %c0_4 = arith.constant 0 : index
    %3 = vector.load %arg3[%c0_3, %c0_4] : memref<128x1xf32, #tpu.memory_space<vmem>>, vector<128x1xf32>
    %4 = vector.broadcast %3 : vector<128x1xf32> to vector<128x128xf32>
    %5 = arith.addf %2, %4 : vector<128x128xf32>
    %cst_5 = arith.constant 0.00999999977 : f32
    %6 = vector.broadcast %cst_5 : f32 to vector<128x128xf32>
    %7 = arith.mulf %6, %5 : vector<128x128xf32>
    %8 = arith.maximumf %5, %7 : vector<128x128xf32>
    %c0_6 = arith.constant 0 : index
    %c0_7 = arith.constant 0 : index
    %9 = vector.load %arg4[%c0_6, %c0_7] : memref<64x128xbf16, #tpu.memory_space<vmem>>, vector<64x128xbf16>
    %10 = arith.truncf %8 : vector<128x128xf32> to vector<128x128xbf16>
    %cst_8 = arith.constant dense<0.000000e+00> : vector<64x128xf32>
    %11 = tpu.matmul %9, %10, %cst_8 {dimension_numbers = #tpu.dot_dimension_numbers<[1], [0], [0], [1], [0, 0, 1, 1], [], []>} : vector<64x128xbf16>, vector<128x128xbf16>, vector<64x128xf32> -> vector<64x128xf32>
    %c0_9 = arith.constant 0 : index
    %c0_10 = arith.constant 0 : index
    %12 = vector.load %arg5[%c0_9, %c0_10] : memref<64x1xf32, #tpu.memory_space<vmem>>, vector<64x1xf32>
    %13 = vector.broadcast %12 : vector<64x1xf32> to vector<64x128xf32>
    %14 = arith.addf %11, %13 : vector<64x128xf32>
    %cst_11 = arith.constant 0.00999999977 : f32
    %15 = vector.broadcast %cst_11 : f32 to vector<64x128xf32>
    %16 = arith.mulf %15, %14 : vector<64x128xf32>
    %17 = arith.maximumf %14, %16 : vector<64x128xf32>
    %c0_12 = arith.constant 0 : index
    %c0_13 = arith.constant 0 : index
    %18 = vector.load %arg6[%c0_12, %c0_13] : memref<8x64xbf16, #tpu.memory_space<vmem>>, vector<8x64xbf16>
    %19 = arith.truncf %17 : vector<64x128xf32> to vector<64x128xbf16>
    %cst_14 = arith.constant dense<0.000000e+00> : vector<8x128xf32>
    %20 = tpu.matmul %18, %19, %cst_14 {dimension_numbers = #tpu.dot_dimension_numbers<[1], [0], [0], [1], [0, 0, 1, 1], [], []>} : vector<8x64xbf16>, vector<64x128xbf16>, vector<8x128xf32> -> vector<8x128xf32>
    %c0_15 = arith.constant 0 : index
    %c0_16 = arith.constant 0 : index
    %21 = vector.load %arg7[%c0_15, %c0_16] : memref<8x1xf32, #tpu.memory_space<vmem>>, vector<8x1xf32>
    %22 = vector.broadcast %21 : vector<8x1xf32> to vector<8x128xf32>
    %23 = arith.addf %20, %22 : vector<8x128xf32>
    %cst_17 = arith.constant dense<0xFF800000> : vector<128xf32>
    %24 = vector.multi_reduction <maximumf>, %23, %cst_17 [0] : vector<8x128xf32> to vector<128xf32>
    %25 = vector.shape_cast %24 : vector<128xf32> to vector<1x128xf32>
    %26 = vector.broadcast %25 : vector<1x128xf32> to vector<8x128xf32>
    %27 = arith.subf %23, %26 : vector<8x128xf32>
    %28 = math.exp %27 : vector<8x128xf32>
    %cst_18 = arith.constant dense<0.000000e+00> : vector<128xf32>
    %29 = vector.multi_reduction <add>, %28, %cst_18 [0] : vector<8x128xf32> to vector<128xf32>
    %30 = vector.shape_cast %29 : vector<128xf32> to vector<1x128xf32>
    %31 = tpu.reciprocal %30 {approx = true} : vector<1x128xf32> -> vector<1x128xf32>
    %32 = vector.broadcast %31 : vector<1x128xf32> to vector<8x128xf32>
    %33 = arith.mulf %28, %32 : vector<8x128xf32>
    %c0_19 = arith.constant 0 : index
    %c0_20 = arith.constant 0 : index
    %34 = vector.load %arg8[%c0_19, %c0_20] : memref<8x128xf32, #tpu.memory_space<vmem>>, vector<8x128xf32>
    tpu.vector_store %arg8[%c0_19, %c0_20], %33 {strides = array<i32>} : memref<8x128xf32, #tpu.memory_space<vmem>>, vector<8x128xf32>,
    return
  }
  func.func @transform_0(%arg0: i32) -> (i32, i32) {
    %c0_i32 = arith.constant 0 : i32
    %c0_i32_0 = arith.constant 0 : i32
    return %c0_i32, %arg0 : i32, i32
  }
  func.func @transform_1(%arg0: i32) -> (i32, i32) {
    %c0_i32 = arith.constant 0 : i32
    %c0_i32_0 = arith.constant 0 : i32
    %c0_i32_1 = arith.constant 0 : i32
    return %c0_i32, %c0_i32_0 : i32, i32
  }
  func.func @transform_2(%arg0: i32) -> (i32, i32) {
    %c0_i32 = arith.constant 0 : i32
    %c0_i32_0 = arith.constant 0 : i32
    %c0_i32_1 = arith.constant 0 : i32
    return %c0_i32, %c0_i32_0 : i32, i32
  }
  func.func @transform_3(%arg0: i32) -> (i32, i32) {
    %c0_i32 = arith.constant 0 : i32
    %c0_i32_0 = arith.constant 0 : i32
    %c0_i32_1 = arith.constant 0 : i32
    return %c0_i32, %c0_i32_0 : i32, i32
  }
  func.func @transform_4(%arg0: i32) -> (i32, i32) {
    %c0_i32 = arith.constant 0 : i32
    %c0_i32_0 = arith.constant 0 : i32
    %c0_i32_1 = arith.constant 0 : i32
    return %c0_i32, %c0_i32_0 : i32, i32
  }
  func.func @transform_5(%arg0: i32) -> (i32, i32) {
    %c0_i32 = arith.constant 0 : i32
    %c0_i32_0 = arith.constant 0 : i32
    %c0_i32_1 = arith.constant 0 : i32
    return %c0_i32, %c0_i32_0 : i32, i32
  }
  func.func @transform_6(%arg0: i32) -> (i32, i32) {
    %c0_i32 = arith.constant 0 : i32
    %c0_i32_0 = arith.constant 0 : i32
    %c0_i32_1 = arith.constant 0 : i32
    return %c0_i32, %c0_i32_0 : i32, i32
  }
  func.func @transform_7(%arg0: i32) -> (i32, i32) {
    %c0_i32 = arith.constant 0 : i32
    %c0_i32_0 = arith.constant 0 : i32
    return %c0_i32, %arg0 : i32, i32
  }
}

</mosaic_0001>

<bundles_post_ra>
// kernel: gating_forward.1
= control target key start
LH: loop header
LB: loop body
LE: loop exit
PB: predicated region body
PF: predicated region fallthrough
CT: control target
= control target key end

     0   :  { %vm187_vm0 = vcmask 130048   ;;  %v711_v1 = vmov 0   ;;  %vm713_vm1 = vmmov 0   ;;  %vm521_vm2 = vcmask 523264   ;;  %s894_s0 = inlined_call_operand.vmem [shape: bf16[16,128], index: 0, kind: input, shape index: {}]   ;;  %s895_s1 = inlined_call_operand.vmem [shape: bf16[128,16], index: 1, kind: input, shape index: {}]   ;;  %s896_s2 = inlined_call_operand.vmem [shape: f32[128,1], index: 2, kind: input, shape index: {}]   ;;  %s897_s4 = inlined_call_operand.vmem [shape: f32[64,1], index: 4, kind: input, shape index: {}]   ;;  %s898_s6 = inlined_call_operand.vmem [shape: f32[8,1], index: 6, kind: input, shape index: {}]   ;;  %s899_s3 = inlined_call_operand.vmem [shape: bf16[64,128], index: 3, kind: input, shape index: {}]   ;;  %s900_s5 = inlined_call_operand.vmem [shape: bf16[8,64], index: 5, kind: input, shape index: {}]   ;;  %s901_s7 = inlined_call_operand.vmem [shape: f32[8,128], index: 7, kind: output, shape index: {}]  }
   0x1   :  { %v694_v0 = vld [vmem:[%s894_s0] sm:$0xff]   ;;  %692 = vset.pattern.permute.xlu0 %v711_v1  ;;  %693 = vset.pattern.permute.xlu1 %v711_v1  ;;  %v696_v3 = vld [vmem:[%s895_s1 + $0x8] sm:$0xff]   ;;  %v697_v4 = vld [vmem:[%s895_s1 + $0x10] sm:$0xff]  }
   0x2   :  { %v695_v2 = vld [vmem:[%s895_s1] sm:$0xff]   ;;  %635 = vmatprep.subr.bf16.mxu0 %v694_v0  ;;  %v59_v5 = vld [vmem:[%s896_s2 + $0x70] sm:$0xff]  ;;  %v698_v7 = vld [vmem:[%s895_s1 + $0x18] sm:$0xff]  }
   0x3   :  { %636 = vmatpush3.bf16.msra.mxu0 %v694_v0  ;;  %637 = vmatprep.mubr.msk.bf16.mxu0 %vm187_vm0, %v695_v2  ;;  %v57_v6 = vld [vmem:[%s896_s2 + $0x60] sm:$0xff]  ;;  %v60_v9 = vld [vmem:[%s896_s2 + $0x78] sm:$0xff]  ;;  %v58_v10 = vld [vmem:[%s896_s2 + $0x68] sm:$0xff] }
   0x4   :  { %133 = vperm.xlu0 %692, %v59_v5   ;;  %123 = vperm.xlu1 %693, %v57_v6   ;;  %v699_v8 = vld [vmem:[%s895_s1 + $0x20] sm:$0xff]   ;;  %v55_v11 = vld [vmem:[%s896_s2 + $0x50] sm:$0xff]  ;;  %v56_v12 = vld [vmem:[%s896_s2 + $0x58] sm:$0xff] }
   0x5   :  { %v700_v13 = vld [vmem:[%s895_s1 + $0x28] sm:$0xff]   ;;  %v701_v14 = vld [vmem:[%s895_s1 + $0x30] sm:$0xff]   ;;  %v53_v15 = vld [vmem:[%s896_s2 + $0x40] sm:$0xff] }
   0x6   :  { %638 = vmatmul.mubr.msk.bf16.vlgmr.msra.gmra.mxu0 %vm187_vm0, %v696_v3  ;;  %v54_v16 = vld [vmem:[%s896_s2 + $0x48] sm:$0xff]  ;;  %v51_v17 = vld [vmem:[%s896_s2 + $0x30] sm:$0xff]  ;;  %v52_v18 = vld [vmem:[%s896_s2 + $0x38] sm:$0xff] }
   0x7   :  { %641 = vmatprep.mubr.msk.bf16.mxu0 %vm187_vm0, %v697_v4  ;;  %v702_v19 = vld [vmem:[%s895_s1 + $0x38] sm:$0xff]   ;;  %v49_v20 = vld [vmem:[%s896_s2 + $0x20] sm:$0xff]  ;;  %v50_v21 = vld [vmem:[%s896_s2 + $0x28] sm:$0xff] }
   0x8   :  { %138 = vperm.xlu0 %692, %v60_v9   ;;  %128 = vperm.xlu1 %693, %v58_v10   ;;  %v47_v22 = vld [vmem:[%s896_s2 + $0x10] sm:$0xff]  ;;  %v48_v23 = vld [vmem:[%s896_s2 + $0x18] sm:$0xff]  ;;  %v45_v24 = vld [vmem:[%s896_s2] sm:$0xff] }
   0x9   :  { %v46_v25 = vld [vmem:[%s896_s2 + $0x8] sm:$0xff]  ;;  %v363_v26 = vld [vmem:[%s897_s4 + $0x30] sm:$0xff]  ;;  %v364_v27 = vld [vmem:[%s897_s4 + $0x38] sm:$0xff] }
   0xa   :  { %v361_v28 = vld [vmem:[%s897_s4 + $0x20] sm:$0xff]  ;;  %v362_v29 = vld [vmem:[%s897_s4 + $0x28] sm:$0xff]  ;;  %v359_v30 = vld [vmem:[%s897_s4 + $0x10] sm:$0xff] }
   0xb   :  { %v360_v31 = vld [vmem:[%s897_s4 + $0x18] sm:$0xff]  ;;  %v357_v32 = vld [vmem:[%s897_s4] sm:$0xff]  ;;  %v358_v33 = vld [vmem:[%s897_s4 + $0x8] sm:$0xff] }
   0xc   :  { %113 = vperm.xlu0 %692, %v55_v11   ;;  %118 = vperm.xlu1 %693, %v56_v12   ;;  %v515_v34 = vld [vmem:[%s898_s6] sm:$0xff] }
   0xd   :  { %v703_v35 = vld [vmem:[%s899_s3] sm:$0xff]  }
   0xe   :  { %642 = vmatmul.mubr.msk.bf16.gmra.mxu0 %vm187_vm0, %v698_v7  ;;  %669 = vmatprep.mubr.bf16.mxu1 %v703_v35 }
   0xf   :  { %645 = vmatprep.mubr.msk.bf16.mxu0 %vm187_vm0, %v699_v8 }
  0x10   :  { %103 = vperm.xlu0 %692, %v53_v15   ;;  %108 = vperm.xlu1 %693, %v54_v16  }
  0x14   :  { %93 = vperm.xlu0 %692, %v51_v17   ;;  %98 = vperm.xlu1 %693, %v52_v18  }
  0x16   :  { %646 = vmatmul.mubr.msk.bf16.gmra.mxu0 %vm187_vm0, %v700_v13 }
  0x17   :  { %649 = vmatprep.mubr.msk.bf16.mxu0 %vm187_vm0, %v701_v14 }
  0x18   :  { %83 = vperm.xlu0 %692, %v49_v20   ;;  %88 = vperm.xlu1 %693, %v50_v21  }
  0x1c   :  { %73 = vperm.xlu0 %692, %v47_v22   ;;  %78 = vperm.xlu1 %693, %v48_v23  }
  0x1e   :  { %650 = vmatmul.mubr.msk.bf16.gmra.mxu0 %vm187_vm0, %v702_v19 }
  0x20   :  { %63 = vperm.xlu0 %692, %v45_v24   ;;  %68 = vperm.xlu1 %693, %v46_v25  }
  0x24   :  { %397 = vperm.xlu0 %692, %v363_v26   ;;  %402 = vperm.xlu1 %693, %v364_v27  }
  0x28   :  { %387 = vperm.xlu0 %692, %v361_v28   ;;  %392 = vperm.xlu1 %693, %v362_v29  }
  0x2c   :  { %377 = vperm.xlu0 %692, %v359_v30   ;;  %382 = vperm.xlu1 %693, %v360_v31  }
  0x30   :  { %367 = vperm.xlu0 %692, %v357_v32   ;;  %372 = vperm.xlu1 %693, %v358_v33  }
  0x34   :  { %518 = vperm.xlu0 %692, %v515_v34  }
  0x7f   :  { %v124_v38 = vpop.permute.xlu1 %123  ;;  %v134_v40 = vpop.permute.xlu0 %133 }
  0x83   :  { %v129_v43 = vpop.permute.xlu1 %128  ;;  %v139_v45 = vpop.permute.xlu0 %138 }
  0x87   :  { %v119_v48 = vpop.permute.xlu1 %118  ;;  %v114_v50 = vpop.permute.xlu0 %113 }
  0x8b   :  { %v109_v53 = vpop.permute.xlu1 %108  ;;  %v104_v55 = vpop.permute.xlu0 %103 }
  0x8f   :  { %v99_v60 = vpop.permute.xlu1 %98  ;;  %v94_v1 = vpop.permute.xlu0 %93 }
  0x93   :  { %v89_v12 = vpop.permute.xlu1 %88  ;;  %v84_v18 = vpop.permute.xlu0 %83 }
  0x97   :  { %v79_v26 = vpop.permute.xlu1 %78  ;;  %v74_v31 = vpop.permute.xlu0 %73 }
  0xc6   :  { %v867_v36 = vpop.f32.mrf.mxu0 }
  0xc8   :  { %v869_v37 = vpop.f32.mrf.mxu0 }
  0xca   :  { %v871_v39 = vpop.f32.mrf.mxu0 }
  0xcb   :  { %v258_v35 = vadd.f32 %v871_v39, %v79_v26 }
  0xcc   :  { %v873_v41 = vpop.f32.mrf.mxu0 }
  0xce   :  { %v643_v42 = vpop.f32.mrf.mxu0 }
  0xcf   :  { %v271_v23 = vadd.f32 %v643_v42, %v94_v1  ;;  %v69_v42 = vpop.permute.xlu1 %68 }
  0xd0   :  { %v262_v44 = vpop.f32.mrf.mxu0 }
  0xd1   :  { %v315_v32 = vmul.f32 0.01, %v271_v23  ;;  %v263_v33 = vadd.f32 %v262_v44, %v84_v18 }
  0xd2   :  { %v644_v46 = vpop.f32.mrf.mxu0 }
  0xd3   :  { %v274_v19 = vadd.f32 %v644_v46, %v99_v60  ;;  %v331_v46 = vmax.f32 %v271_v23, %v315_v32 }
  0xd4   :  { %v265_v47 = vpop.f32.mrf.mxu0 }
  0xd5   :  { %v316_v27 = vmul.f32 0.01, %v274_v19  ;;  %v266_v28 = vadd.f32 %v265_v47, %v89_v12  ;;  %v64_v47 = vpop.permute.xlu0 %63 }
  0xd6   :  { %v647_v49 = vpop.f32.mrf.mxu0  ;;  %v247_v39 = vadd.f32 %v869_v37, %v64_v47  ;;  %v704_v37 = vld [vmem:[%s899_s3 + $0x8] sm:$0xff]  }
  0xd7   :  { %v287_v2 = vadd.f32 %v647_v49, %v114_v50  ;;  %v312_v49 = vmul.f32 0.01, %v258_v35  ;;  %v250_v50 = vadd.f32 %v873_v41, %v69_v42 }
  0xd8   :  { %v278_v51 = vpop.f32.mrf.mxu0 }
  0xd9   :  { %v319_v13 = vmul.f32 0.01, %v287_v2  ;;  %v279_v14 = vadd.f32 %v278_v51, %v104_v55  ;;  %v310_v55 = vmul.f32 0.01, %v250_v50 }
  0xda   :  { %v648_v52 = vpop.f32.mrf.mxu0 }
  0xdb   :  { %v290_v61 = vadd.f32 %v648_v52, %v119_v48  ;;  %v335_v24 = vmax.f32 %v287_v2, %v319_v13  ;;  %v317_v25 = vmul.f32 0.01, %v279_v14  ;;  %v313_v48 = vmul.f32 0.01, %v263_v33  ;;  %v398_v2 = vpop.permute.xlu0 %397 }
  0xdc   :  { %v281_v54 = vpop.f32.mrf.mxu0 }
  0xdd   :  { %v320_v7 = vmul.f32 0.01, %v290_v61  ;;  %v282_v8 = vadd.f32 %v281_v54, %v109_v53  ;;  %v333_v34 = vmax.f32 %v279_v14, %v317_v25  ;;  %v329_v53 = vmax.f32 %v263_v33, %v313_v48 }
  0xde   :  { %v651_v56 = vpop.f32.mrf.mxu0  ;;  %v328_v54 = vmax.f32 %v258_v35, %v312_v49  ;;  %v510_v49 = vld [vmem:[%s900_s5] sm:$0xf] }
  0xdf   :  { %v303_v57 = vadd.f32 %v651_v56, %v134_v40  ;;  %v336_v20 = vmax.f32 %v290_v61, %v320_v7  ;;  %v318_v21 = vmul.f32 0.01, %v282_v8  ;;  %v314_v40 = vmul.f32 0.01, %v266_v28  ;;  %v705_v61 = vld [vmem:[%s899_s3 + $0x10] sm:$0xff]   ;;  %v388_v7 = vpop.permute.xlu0 %387 }
  0xe0   :  { %v294_v58 = vpop.f32.mrf.mxu0 }
  0xe1   :  { %v295_v59 = vadd.f32 %v294_v58, %v124_v38  ;;  %v323_v63 = vmul.f32 0.01, %v303_v57  ;;  %v334_v29 = vmax.f32 %v282_v8, %v318_v21  ;;  %v354_v30 = vpack.c.bf16 %v336_v20, %v335_v24 }
  0xe2   :  { %v652_v62 = vpop.f32.mrf.mxu0  ;;  %v332_v38 = vmax.f32 %v274_v19, %v316_v27  ;;  %v330_v51 = vmax.f32 %v266_v28, %v314_v40  ;;  %v326_v58 = vmax.f32 %v250_v50, %v310_v55 }
  0xe3   :  { %v306_v0 = vadd.f32 %v652_v62, %v139_v45  ;;  %v321_v4 = vmul.f32 0.01, %v295_v59  ;;  %v339_v9 = vmax.f32 %v303_v57, %v323_v63  ;;  %v255_v45 = vadd.f32 %v867_v36, %v74_v31  ;;  %v706_v62 = vld [vmem:[%s899_s3 + $0x18] sm:$0xff]  }
  0xe4   :  { %v297_v3 = vpop.f32.mrf.mxu0  ;;  %v352_v44 = vpack.c.bf16 %v332_v38, %v331_v46  ;;  %v351_v56 = vpack.c.bf16 %v330_v51, %v329_v53  ;;  %v309_v57 = vmul.f32 0.01, %v247_v39  ;;  %v712_v63 = vmov 0.0  }
  0xe5   :  { %v324_v5 = vmul.f32 0.01, %v306_v0  ;;  %v298_v6 = vadd.f32 %v297_v3, %v129_v43  ;;  %v337_v15 = vmax.f32 %v295_v59, %v321_v4  ;;  %v353_v43 = vpack.c.bf16 %v334_v29, %v333_v34  ;;  %677 = vmatprep.subr.bf16.mxu0 %v712_v63  ;;  %685 = vmatprep.mubr.msk.bf16.mxu0 %vm713_vm1, %v712_v63 }
  0xe6   :  { %v311_v52 = vmul.f32 0.01, %v255_v45  ;;  %v325_v60 = vmax.f32 %v247_v39, %v309_v57 }
  0xe7   :  { %v340_v10 = vmax.f32 %v306_v0, %v324_v5  ;;  %v322_v11 = vmul.f32 0.01, %v298_v6  ;;  %v403_v0 = vpop.permute.xlu1 %402 }
  0xe8   :  { %v327_v36 = vmax.f32 %v255_v45, %v311_v52  ;;  %v349_v41 = vpack.c.bf16 %v326_v58, %v325_v60 }
  0xe9   :  { %v338_v16 = vmax.f32 %v298_v6, %v322_v11  ;;  %v356_v17 = vpack.c.bf16 %v340_v10, %v339_v9 }
  0xea   :  { %v350_v59 = vpack.c.bf16 %v328_v54, %v327_v36 }
  0xeb   :  { %653 = vmatprep.subr.bf16.mxu1 %v356_v17  ;;  %v355_v22 = vpack.c.bf16 %v338_v16, %v337_v15  ;;  %v393_v5 = vpop.permute.xlu1 %392  ;;  %v378_v16 = vpop.permute.xlu0 %377 }
  0xec   :  { %654 = vmatpush3.bf16.msra.mxu1 %v356_v17 }
  0xed   :  { %655 = vmatprep.subr.bf16.mxu1 %v355_v22 }
  0xef   :  { %v383_v11 = vpop.permute.xlu1 %382  ;;  %v368_v31 = vpop.permute.xlu0 %367 }
  0xf0   :  { %656 = vmatpush3.bf16.msra.mxu1 %v355_v22 }
  0xf1   :  { %657 = vmatprep.subr.bf16.mxu1 %v354_v30 }
  0xf3   :  { %v373_v26 = vpop.permute.xlu1 %372  ;;  %v519_v50 = vpop.permute.xlu0 %518 }
  0xf4   :  { %658 = vmatpush3.bf16.msra.mxu1 %v354_v30 }
  0xf5   :  { %659 = vmatprep.subr.bf16.mxu1 %v353_v43 }
  0xf8   :  { %660 = vmatpush3.bf16.msra.mxu1 %v353_v43 }
  0xf9   :  { %661 = vmatprep.subr.bf16.mxu1 %v352_v44 }
  0xfc   :  { %662 = vmatpush3.bf16.msra.mxu1 %v352_v44 }
  0xfd   :  { %663 = vmatprep.subr.bf16.mxu1 %v351_v56 }
 0x100   :  { %664 = vmatpush3.bf16.msra.mxu1 %v351_v56 }
 0x101   :  { %665 = vmatprep.subr.bf16.mxu1 %v350_v59 }
 0x104   :  { %666 = vmatpush3.bf16.msra.mxu1 %v350_v59 }
 0x105   :  { %667 = vmatprep.subr.bf16.mxu1 %v349_v41 }
 0x108   :  { %668 = vmatpush3.bf16.msra.mxu1 %v349_v41 }
 0x10b   :  { %670 = vmatmul.mubr.bf16.vlgmr.msra.gmra.mxu1 %v704_v37 }
 0x10c   :  { %673 = vmatprep.mubr.bf16.mxu1 %v705_v61 }
 0x113   :  { %674 = vmatmul.mubr.bf16.gmra.mxu1 %v706_v62 }
 0x1cb   :  { %v671_v1 = vpop.f32.mrf.mxu1 }
 0x1cc   :  { %v472_v21 = vadd.f32 %v671_v1, %v378_v16 }
 0x1cd   :  { %v463_v3 = vpop.f32.mrf.mxu1 }
 0x1ce   :  { %v496_v32 = vmul.f32 0.01, %v472_v21  ;;  %v464_v33 = vadd.f32 %v463_v3, %v368_v31 }
 0x1cf   :  { %v672_v4 = vpop.f32.mrf.mxu1 }
 0x1d0   :  { %v475_v18 = vadd.f32 %v672_v4, %v383_v11  ;;  %v504_v43 = vmax.f32 %v472_v21, %v496_v32  ;;  %v494_v42 = vmul.f32 0.01, %v464_v33 }
 0x1d1   :  { %v466_v6 = vpop.f32.mrf.mxu1 }
 0x1d2   :  { %v497_v27 = vmul.f32 0.01, %v475_v18  ;;  %v467_v28 = vadd.f32 %v466_v6, %v373_v26  ;;  %v502_v48 = vmax.f32 %v464_v33, %v494_v42 }
 0x1d3   :  { %v675_v8 = vpop.f32.mrf.mxu1 }
 0x1d4   :  { %v488_v9 = vadd.f32 %v675_v8, %v398_v2  ;;  %v505_v35 = vmax.f32 %v475_v18, %v497_v27  ;;  %v495_v38 = vmul.f32 0.01, %v467_v28 }
 0x1d5   :  { %v479_v10 = vpop.f32.mrf.mxu1 }
 0x1d6   :  { %v500_v13 = vmul.f32 0.01, %v488_v9  ;;  %v480_v14 = vadd.f32 %v479_v10, %v388_v7  ;;  %v512_v45 = vpack.c.bf16 %v505_v35, %v504_v43  ;;  %v503_v46 = vmax.f32 %v467_v28, %v495_v38 }
 0x1d7   :  { %v676_v12 = vpop.f32.mrf.mxu1 }
 0x1d8   :  { %v491_v15 = vadd.f32 %v676_v12, %v403_v0  ;;  %v508_v22 = vmax.f32 %v488_v9, %v500_v13  ;;  %v498_v23 = vmul.f32 0.01, %v480_v14  ;;  %v511_v47 = vpack.c.bf16 %v503_v46, %v502_v48 }
 0x1d9   :  { %v482_v17 = vpop.f32.mrf.mxu1 }
 0x1da   :  { %v501_v19 = vmul.f32 0.01, %v491_v15  ;;  %v483_v20 = vadd.f32 %v482_v17, %v393_v5  ;;  %v506_v34 = vmax.f32 %v480_v14, %v498_v23 }
 0x1dc   :  { %v509_v24 = vmax.f32 %v491_v15, %v501_v19  ;;  %v499_v25 = vmul.f32 0.01, %v483_v20 }
 0x1de   :  { %v514_v29 = vpack.c.bf16 %v509_v24, %v508_v22  ;;  %v507_v30 = vmax.f32 %v483_v20, %v499_v25 }
 0x1e0   :  { %678 = vmatpush3.bf16.msra.mxu0 %v514_v29  ;;  %v513_v40 = vpack.c.bf16 %v507_v30, %v506_v34 }
 0x1e1   :  { %679 = vmatprep.subr.bf16.mxu0 %v712_v63 }
 0x1e4   :  { %680 = vmatpush3.bf16.msra.mxu0 %v513_v40 }
 0x1e5   :  { %681 = vmatprep.subr.bf16.mxu0 %v712_v63 }
 0x1e8   :  { %682 = vmatpush3.bf16.msra.mxu0 %v512_v45 }
 0x1e9   :  { %683 = vmatprep.subr.bf16.mxu0 %v712_v63 }
 0x1ec   :  { %684 = vmatpush3.bf16.msra.mxu0 %v511_v47 }
 0x1ef   :  { %686 = vmatmul.mubr.msk.bf16.vlgmr.msra.gmra.mxu0 %vm521_vm2, %v510_v49 }
 0x2af   :  { %v559_v51 = vpop.f32.mrf.mxu0 }
 0x2b0   :  { %v560_v44 = vadd.f32 %v559_v51, %v519_v50 }
 0x2b1   :  { %v687_v52 = vpop.f32.mrf.mxu0 }
 0x2b2   :  { %v565_v39 = vrot.slane %v560_v44, 4 }
 0x2b3   :  { %v562_v53 = vpop.f32.mrf.mxu0 }
 0x2b4   :  { %v566_v54 = vmax.f32 %v560_v44, %v565_v39 }
 0x2b5   :  { %v688_v55 = vpop.f32.mrf.mxu0 }
 0x2b6   :  { %v567_v56 = vrot.slane %v566_v54, 2 }
 0x2b8   :  { %v568_v36 = vmax.f32 %v566_v54, %v567_v56 }
 0x2ba   :  { %v569_v57 = vrot.slane %v568_v36, 1 }
 0x2bc   :  { %v570_v58 = vmax.f32 %v568_v36, %v569_v57 }
 0x2be   :  { %v571_v59 = vsub.f32 %v560_v44, %v570_v58 }
 0x2c0   :  { %v572_v60 = vmul.f32 1.442695, %v571_v59 }
 0x2c2   :  { %707 = vpow2.f32 %v572_v60 }
 0x2cf   :  { %v708_v41 = vpop.eup %707 }
 0x2d0   :  { %v574_v37 = vrot.slane %v708_v41, 4 }
 0x2d2   :  { %v575_v61 = vadd.f32 %v708_v41, %v574_v37 }
 0x2d4   :  { %v576_v62 = vrot.slane %v575_v61, 2 }
 0x2d6   :  { %v577_v63 = vadd.f32 %v576_v62, %v575_v61 }
 0x2d8   :  { %v578_v0 = vrot.slane %v577_v63, 1 }
 0x2da   :  { %v579_v1 = vadd.f32 %v578_v0, %v577_v63 }
 0x2dc   :  { %709 = vrcp.f32 %v579_v1 }
 0x2e9   :  { %v710_v2 = vpop.eup %709 }
 0x2ea   :  { %v581_v3 = vmul.f32 %v710_v2, %v708_v41 }
 0x2ec   :  { %582 = vst [vmem:[%s901_s7] sm:$0xff] %v581_v3 }

</bundles_post_ra>
